<compile_context>
chip_gen: v6e
topology: v6e:2x2x1
jax: 0.10.0
libtpu: 0.0.40
codegen_flags: <defaults>
</compile_context>

<pallas_src>
import functools

import numpy as np

import jax
import jax.numpy as jnp
from jax.experimental import pallas as pl
from jax.experimental.pallas import tpu as pltpu


def _round_up(n, m):
    return ((n + m - 1) // m) * m


def _make_fused_kernel(*, N, H, W, ksize, num_hidden, cmax, use_bn, eps):
    """Builds the fused whole-network kernel (all convs + BN + ReLU in one body).

    Internal layout: (channels, N*H*W) -- channels on sublanes (padded to 8),
    flat spatial on the lane axis.  cmax = largest padded Cin over all convs.
    """
    NHW = N * H * W
    HW = H * W
    pad = ksize // 2
    inv_nhw = 1.0 / float(NHW)

    def _mod(v, m):
        # Power-of-two fast path keeps the lowering to simple bitwise VPU ops.
        if (m & (m - 1)) == 0:
            return v & (m - 1)
        return v % m

    def kernel(*refs):
        x_ref = refs[0]
        hidden_refs = refs[1:1 + 4 * num_hidden]
        wmo_ref = refs[1 + 4 * num_hidden]
        bo_ref = refs[2 + 4 * num_hidden]
        out_ref = refs[3 + 4 * num_hidden]

        # ---- 'same' zero-padding boundary masks, generated in-kernel from one
        # broadcasted_iota (no HBM mask input), separable row/col factors only,
        # materialized ONCE at (cmax, NHW) so no broadcast is re-emitted per conv.
        f = jax.lax.broadcasted_iota(jnp.int32, (cmax, NHW), 1)  # flat spatial idx
        j = _mod(f, W)            # column j within an image row
        fi = _mod(f, HW)          # flat index within one image (= i*W + j)
        colm, rowm = {}, {}
        for d in range(-pad, pad + 1):
            if d == 0:
                continue
            colm[d] = jnp.where((j + d >= 0) & (j + d < W), 1.0, 0.0)
            rowm[d] = jnp.where((fi + d * W >= 0) & (fi + d * W < HW), 1.0, 0.0)

        def rows(m, cin):
            return m if cin == cmax else m[:cin, :]

        def conv(act, wm_ref):
            """'same' ksize x ksize conv, act (Cin_p, NHW) -> (Cout_p, NHW).

            Taps are built fully in vregs (XLU lane-rolls + VPU mask multiplies),
            concatenated along sublanes and fed to ONE MXU matmul
            (Cout_p, K*K*Cin_p) @ (K*K*Cin_p, NHW) -- no im2col VMEM staging."""
            cin = act.shape[0]
            # Column-shifted (+ column-masked) intermediates, shared by all row
            # shifts below.  Center column (dw==0) needs neither roll nor mask.
            cshift = {}
            for dw in range(-pad, pad + 1):
                if dw == 0:
                    cshift[dw] = act
                else:
                    v = pltpu.roll(act, (-dw) % NHW, axis=1)
                    cshift[dw] = v * rows(colm[dw], cin)
            taps = []
            for dh in range(-pad, pad + 1):           # order matches weight packing
                for dw in range(-pad, pad + 1):
                    v = cshift[dw]
                    if dh != 0:
                        v = pltpu.roll(v, (-dh * W) % NHW, axis=1)
                        v = v * rows(rowm[dh], cin)
                    taps.append(v)
            a = jnp.concatenate(taps, axis=0)          # (k2*Cin_p, NHW), in vregs
            return jnp.dot(wm_ref[...], a, preferred_element_type=jnp.float32)

        act = x_ref[...]                               # (Cin_p, NHW)
        for l in range(num_hidden):
            wm_ref, b_ref, g_ref, be_ref = hidden_refs[4 * l:4 * (l + 1)]
            y = conv(act, wm_ref)                      # (Ch_p, NHW)
            if use_bn:
                # Train-mode BatchNorm2d (batch mean / biased variance over
                # N,H,W).  Mean-shifted variance for numerical stability; the
                # conv bias is omitted because mean subtraction cancels it.
                mean = jnp.sum(y, axis=1, keepdims=True) * inv_nhw
                d = y - mean
                var = jnp.sum(d * d, axis=1, keepdims=True) * inv_nhw
                y = d * jax.lax.rsqrt(var + eps)
                y = y * g_ref[...] + be_ref[...]
                # TODO(synk): BatchNorm running_mean/running_var updates (a
                # training-time side effect) and the eval-mode running-stats path
                # are not reproduced; only the train-mode forward output is.
            else:
                y = y + b_ref[...]
            act = jnp.maximum(y, 0.0)                  # ReLU

        # Output conv: only row 0 is the real channel, but storing the whole
        # padded tile keeps the final store lane- and sublane-dense (unmasked).
        out_ref[...] = conv(act, wmo_ref) + bo_ref[...]

    return kernel


def init_params(key, input_channels, hidden_channels, num_hidden_layers,
                num_classes, kernel_size=3):
    """Canonical parameters mirroring the PyTorch module (HWIO conv weights).

    (num_classes is unused by SimpleCNN.forward -- kept for signature parity.)
    """
    del num_classes
    params = {"hidden": []}
    cin = input_channels
    for _ in range(num_hidden_layers):
        key, kw_, kb_ = jax.random.split(key, 3)
        fan_in = cin * kernel_size * kernel_size
        bound = 1.0 / float(np.sqrt(fan_in))
        w = jax.random.uniform(kw_, (kernel_size, kernel_size, cin, hidden_channels),
                               jnp.float32, -bound, bound)
        b = jax.random.uniform(kb_, (hidden_channels,), jnp.float32, -bound, bound)
        params["hidden"].append({
            "w": w, "b": b,
            "gamma": jnp.ones((hidden_channels,), jnp.float32),   # BN defaults
            "beta": jnp.zeros((hidden_channels,), jnp.float32)})
        cin = hidden_channels
    key, kw_, kb_ = jax.random.split(key, 3)
    fan_in = cin * kernel_size * kernel_size
    bound = 1.0 / float(np.sqrt(fan_in))
    params["out"] = {
        "w": jax.random.uniform(kw_, (kernel_size, kernel_size, cin, 1),
                                jnp.float32, -bound, bound),
        "b": jax.random.uniform(kb_, (1,), jnp.float32, -bound, bound)}
    return params


def pack_params(params):
    """One-time conversion of canonical HWIO params to the fused-kernel layout:
    weights as (Cout_pad, K*K*Cin_pad) matmul operands and per-channel vectors as
    (Cout_pad, 1), channels zero-padded to multiples of 8 (f32 sublane count).
    (At real channel counts the wm operands would be stored bf16 and Cout padded
    toward the MXU row count -- f32 kept here for the toy sizes.)"""
    def pack_conv(w, b, gamma=None, beta=None):
        KH, KW, cin, cout = w.shape
        cp, op = _round_up(cin, 8), _round_up(cout, 8)
        wp = jnp.zeros((KH, KW, cp, op), jnp.float32).at[:, :, :cin, :cout].set(w)
        def vec(v):
            return jnp.zeros((op, 1), jnp.float32).at[:cout, 0].set(v.reshape(-1))
        packed = {"wm": wp.reshape(KH * KW * cp, op).T, "b": vec(b)}
        if gamma is not None:
            packed["gamma"] = vec(gamma)
            packed["beta"] = vec(beta)
        return packed

    return {"hidden": [pack_conv(l["w"], l["b"], l["gamma"], l["beta"])
                       for l in params["hidden"]],
            "out": pack_conv(params["out"]["w"], params["out"]["b"])}


def simple_cnn_forward(x_nchw, packed, *, use_batchnormalization, kernel_size=3):
    """Fused forward pass: the entire network is a single grid-less pallas_call."""
    N, C, H, W = x_nchw.shape
    NHW = N * H * W
    k2 = kernel_size * kernel_size

    first = packed["hidden"][0] if packed["hidden"] else packed["out"]
    cp = first["wm"].shape[1] // k2               # padded input-channel count
    assert cp == _round_up(C, 8), (cp, C)

    # Single tiny layout-prep op (fused under jit): NCHW -> (C_pad, N*H*W) with
    # channels on sublanes and spatial on lanes.  At real sizes this relayout
    # would instead be absorbed into a batch/row grid axis (see scale-up notes).
    x_flat = jnp.transpose(x_nchw.astype(jnp.float32), (1, 0, 2, 3)).reshape(C, NHW)
    if cp > C:
        x_flat = jnp.pad(x_flat, ((0, cp - C), (0, 0)))

    args = [x_flat]
    for layer in packed["hidden"]:
        args += [layer["wm"], layer["b"], layer["gamma"], layer["beta"]]
    args += [packed["out"]["wm"], packed["out"]["b"]]

    cin_pads = [l["wm"].shape[1] // k2 for l in packed["hidden"]]
    cin_pads.append(packed["out"]["wm"].shape[1] // k2)
    cmax = max(cin_pads)                          # largest padded Cin (mask width)
    cout_pad = packed["out"]["wm"].shape[0]       # padded output channels (=8)

    kernel = _make_fused_kernel(N=N, H=H, W=W, ksize=kernel_size,
                                num_hidden=len(packed["hidden"]),
                                cmax=cmax, use_bn=use_batchnormalization, eps=1e-5)

    # Grid-less call: every operand is consumed whole in one step, stays resident
    # in VMEM, and nothing is needlessly double-buffered / pipelined.
    out_flat = pl.pallas_call(
        kernel,
        out_shape=jax.ShapeDtypeStruct((cout_pad, NHW), jnp.float32),
    )(*args)
    # Row 0 is the real output channel; (1, N*H*W) -> (N, 1, H, W) is free
    # contiguous layout plumbing.
    return out_flat[:1, :].reshape(N, 1, H, W)


# ---------------------------------------------------------------------------
# Pure-JAX reference (numerical sanity check of the fused Pallas kernel).
# ---------------------------------------------------------------------------
def _ref_forward(x_nchw, params, *, use_batchnormalization, eps=1e-5):
    x = jnp.transpose(x_nchw, (0, 2, 3, 1)).astype(jnp.float32)
    w0 = params["hidden"][0]["w"] if params["hidden"] else params["out"]["w"]
    dn = jax.lax.conv_dimension_numbers(x.shape, w0.shape, ("NHWC", "HWIO", "NHWC"))

    def conv(x, w, b):
        y = jax.lax.conv_general_dilated(x, w, (1, 1), "SAME", dimension_numbers=dn)
        return y + b.reshape(1, 1, 1, -1)

    for layer in params["hidden"]:
        y = conv(x, layer["w"], layer["b"])
        if use_batchnormalization:
            mean = jnp.mean(y, axis=(0, 1, 2), keepdims=True)
            var = jnp.mean((y - mean) ** 2, axis=(0, 1, 2), keepdims=True)
            y = (y - mean) * jax.lax.rsqrt(var + eps)
            y = y * layer["gamma"].reshape(1, 1, 1, -1) + layer["beta"].reshape(1, 1, 1, -1)
        x = jnp.maximum(y, 0.0)
    y = conv(x, params["out"]["w"], params["out"]["b"])
    return jnp.transpose(y, (0, 3, 1, 2))


if __name__ == "__main__":
    # Module hyper-parameters (small, consistent with SimpleCNN.__init__).
    batch, input_channels, hidden_channels = 2, 4, 8
    num_hidden_layers, num_classes = 2, 10
    H = W = 16

    key = jax.random.PRNGKey(0)
    key, kx = jax.random.split(key)
    x = jax.random.normal(kx, (batch, input_channels, H, W), jnp.float32)  # NCHW

    params = init_params(key, input_channels, hidden_channels,
                         num_hidden_layers, num_classes, kernel_size=3)
    packed = pack_params(params)      # one-time conversion to kernel layout

    for use_bn in (True, False):
        fwd = jax.jit(functools.partial(simple_cnn_forward,
                                        use_batchnormalization=use_bn))
        out = jax.block_until_ready(fwd(x, packed))
        assert out.shape == (batch, 1, H, W), out.shape

        ref = jax.block_until_ready(
            _ref_forward(x, params, use_batchnormalization=use_bn))
        assert jnp.allclose(out, ref, rtol=1e-4, atol=1e-4), \
            float(jnp.max(jnp.abs(out - ref)))

    print("KERNEL_OK")
</pallas_src>

<mosaic_0001>
module attributes {stable_mosaic.version = 11 : i64} {
  func.func @kernel(%arg0: memref<8x512xf32, #tpu.memory_space<vmem>>, %arg1: memref<8x72xf32, #tpu.memory_space<vmem>>, %arg2: memref<8x1xf32, #tpu.memory_space<vmem>>, %arg3: memref<8x1xf32, #tpu.memory_space<vmem>>, %arg4: memref<8x1xf32, #tpu.memory_space<vmem>>, %arg5: memref<8x72xf32, #tpu.memory_space<vmem>>, %arg6: memref<8x1xf32, #tpu.memory_space<vmem>>, %arg7: memref<8x1xf32, #tpu.memory_space<vmem>>, %arg8: memref<8x1xf32, #tpu.memory_space<vmem>>, %arg9: memref<8x72xf32, #tpu.memory_space<vmem>>, %arg10: memref<8x1xf32, #tpu.memory_space<vmem>>, %arg11: memref<8x512xf32, #tpu.memory_space<vmem>>) attributes {dimension_semantics = [], scalar_prefetch = 0 : i64, scratch_operands = 0 : i64, tpu.core_type = #tpu.core_type<tc>} {
    %0 = tpu.iota {dimensions = array<i32: 1>} : vector<8x512xi32>
    %c15_i32 = arith.constant 15 : i32
    %1 = vector.broadcast %c15_i32 : i32 to vector<8x512xi32>
    %2 = arith.andi %0, %1 : vector<8x512xi32>
    %c255_i32 = arith.constant 255 : i32
    %3 = vector.broadcast %c255_i32 : i32 to vector<8x512xi32>
    %4 = arith.andi %0, %3 : vector<8x512xi32>
    %c-1_i32 = arith.constant -1 : i32
    %5 = vector.broadcast %c-1_i32 : i32 to vector<8x512xi32>
    %6 = arith.addi %2, %5 : vector<8x512xi32>
    %c0_i32 = arith.constant 0 : i32
    %7 = vector.broadcast %c0_i32 : i32 to vector<8x512xi32>
    %8 = arith.cmpi sge, %6, %7 : vector<8x512xi32>
    %c-1_i32_0 = arith.constant -1 : i32
    %9 = vector.broadcast %c-1_i32_0 : i32 to vector<8x512xi32>
    %10 = arith.addi %2, %9 : vector<8x512xi32>
    %c16_i32 = arith.constant 16 : i32
    %11 = vector.broadcast %c16_i32 : i32 to vector<8x512xi32>
    %12 = arith.cmpi slt, %10, %11 : vector<8x512xi32>
    %13 = arith.andi %8, %12 : vector<8x512xi1>
    %cst = arith.constant 1.000000e+00 : f32
    %cst_1 = arith.constant 0.000000e+00 : f32
    %14 = vector.broadcast %cst : f32 to vector<8x512xf32>
    %15 = vector.broadcast %cst_1 : f32 to vector<8x512xf32>
    %16 = arith.select %13, %14, %15 : vector<8x512xi1>, vector<8x512xf32>
    %c-16_i32 = arith.constant -16 : i32
    %17 = vector.broadcast %c-16_i32 : i32 to vector<8x512xi32>
    %18 = arith.addi %4, %17 : vector<8x512xi32>
    %c0_i32_2 = arith.constant 0 : i32
    %19 = vector.broadcast %c0_i32_2 : i32 to vector<8x512xi32>
    %20 = arith.cmpi sge, %18, %19 : vector<8x512xi32>
    %c-16_i32_3 = arith.constant -16 : i32
    %21 = vector.broadcast %c-16_i32_3 : i32 to vector<8x512xi32>
    %22 = arith.addi %4, %21 : vector<8x512xi32>
    %c256_i32 = arith.constant 256 : i32
    %23 = vector.broadcast %c256_i32 : i32 to vector<8x512xi32>
    %24 = arith.cmpi slt, %22, %23 : vector<8x512xi32>
    %25 = arith.andi %20, %24 : vector<8x512xi1>
    %cst_4 = arith.constant 1.000000e+00 : f32
    %cst_5 = arith.constant 0.000000e+00 : f32
    %26 = vector.broadcast %cst_4 : f32 to vector<8x512xf32>
    %27 = vector.broadcast %cst_5 : f32 to vector<8x512xf32>
    %28 = arith.select %25, %26, %27 : vector<8x512xi1>, vector<8x512xf32>
    %c1_i32 = arith.constant 1 : i32
    %29 = vector.broadcast %c1_i32 : i32 to vector<8x512xi32>
    %30 = arith.addi %2, %29 : vector<8x512xi32>
    %c0_i32_6 = arith.constant 0 : i32
    %31 = vector.broadcast %c0_i32_6 : i32 to vector<8x512xi32>
    %32 = arith.cmpi sge, %30, %31 : vector<8x512xi32>
    %c1_i32_7 = arith.constant 1 : i32
    %33 = vector.broadcast %c1_i32_7 : i32 to vector<8x512xi32>
    %34 = arith.addi %2, %33 : vector<8x512xi32>
    %c16_i32_8 = arith.constant 16 : i32
    %35 = vector.broadcast %c16_i32_8 : i32 to vector<8x512xi32>
    %36 = arith.cmpi slt, %34, %35 : vector<8x512xi32>
    %37 = arith.andi %32, %36 : vector<8x512xi1>
    %cst_9 = arith.constant 1.000000e+00 : f32
    %cst_10 = arith.constant 0.000000e+00 : f32
    %38 = vector.broadcast %cst_9 : f32 to vector<8x512xf32>
    %39 = vector.broadcast %cst_10 : f32 to vector<8x512xf32>
    %40 = arith.select %37, %38, %39 : vector<8x512xi1>, vector<8x512xf32>
    %c16_i32_11 = arith.constant 16 : i32
    %41 = vector.broadcast %c16_i32_11 : i32 to vector<8x512xi32>
    %42 = arith.addi %4, %41 : vector<8x512xi32>
    %c0_i32_12 = arith.constant 0 : i32
    %43 = vector.broadcast %c0_i32_12 : i32 to vector<8x512xi32>
    %44 = arith.cmpi sge, %42, %43 : vector<8x512xi32>
    %c16_i32_13 = arith.constant 16 : i32
    %45 = vector.broadcast %c16_i32_13 : i32 to vector<8x512xi32>
    %46 = arith.addi %4, %45 : vector<8x512xi32>
    %c256_i32_14 = arith.constant 256 : i32
    %47 = vector.broadcast %c256_i32_14 : i32 to vector<8x512xi32>
    %48 = arith.cmpi slt, %46, %47 : vector<8x512xi32>
    %49 = arith.andi %44, %48 : vector<8x512xi1>
    %cst_15 = arith.constant 1.000000e+00 : f32
    %cst_16 = arith.constant 0.000000e+00 : f32
    %50 = vector.broadcast %cst_15 : f32 to vector<8x512xf32>
    %51 = vector.broadcast %cst_16 : f32 to vector<8x512xf32>
    %52 = arith.select %49, %50, %51 : vector<8x512xi1>, vector<8x512xf32>
    %c0 = arith.constant 0 : index
    %c0_17 = arith.constant 0 : index
    %53 = vector.load %arg0[%c0, %c0_17] : memref<8x512xf32, #tpu.memory_space<vmem>>, vector<8x512xf32>
    %c1_i32_18 = arith.constant 1 : i32
    %54 = tpu.dynamic_rotate %53 by %c1_i32_18 dim 1 : vector<8x512xf32>, i32 -> vector<8x512xf32>
    %55 = arith.mulf %54, %16 : vector<8x512xf32>
    %c511_i32 = arith.constant 511 : i32
    %56 = tpu.dynamic_rotate %53 by %c511_i32 dim 1 : vector<8x512xf32>, i32 -> vector<8x512xf32>
    %57 = arith.mulf %56, %40 : vector<8x512xf32>
    %c16_i32_19 = arith.constant 16 : i32
    %58 = tpu.dynamic_rotate %55 by %c16_i32_19 dim 1 : vector<8x512xf32>, i32 -> vector<8x512xf32>
    %59 = arith.mulf %58, %28 : vector<8x512xf32>
    %c16_i32_20 = arith.constant 16 : i32
    %60 = tpu.dynamic_rotate %53 by %c16_i32_20 dim 1 : vector<8x512xf32>, i32 -> vector<8x512xf32>
    %61 = arith.mulf %60, %28 : vector<8x512xf32>
    %c16_i32_21 = arith.constant 16 : i32
    %62 = tpu.dynamic_rotate %57 by %c16_i32_21 dim 1 : vector<8x512xf32>, i32 -> vector<8x512xf32>
    %63 = arith.mulf %62, %28 : vector<8x512xf32>
    %c496_i32 = arith.constant 496 : i32
    %64 = tpu.dynamic_rotate %55 by %c496_i32 dim 1 : vector<8x512xf32>, i32 -> vector<8x512xf32>
    %65 = arith.mulf %64, %52 : vector<8x512xf32>
    %c496_i32_22 = arith.constant 496 : i32
    %66 = tpu.dynamic_rotate %53 by %c496_i32_22 dim 1 : vector<8x512xf32>, i32 -> vector<8x512xf32>
    %67 = arith.mulf %66, %52 : vector<8x512xf32>
    %c496_i32_23 = arith.constant 496 : i32
    %68 = tpu.dynamic_rotate %57 by %c496_i32_23 dim 1 : vector<8x512xf32>, i32 -> vector<8x512xf32>
    %69 = arith.mulf %68, %52 : vector<8x512xf32>
    %70 = tpu.concatenate %59, %61, %63, %55, %53, %57, %65, %67, %69 in 0 : vector<8x512xf32>, vector<8x512xf32>, vector<8x512xf32>, vector<8x512xf32>, vector<8x512xf32>, vector<8x512xf32>, vector<8x512xf32>, vector<8x512xf32>, vector<8x512xf32> -> vector<72x512xf32>
    %c0_24 = arith.constant 0 : index
    %c0_25 = arith.constant 0 : index
    %71 = vector.load %arg1[%c0_24, %c0_25] : memref<8x72xf32, #tpu.memory_space<vmem>>, vector<8x72xf32>
    %cst_26 = arith.constant dense<0.000000e+00> : vector<8x512xf32>
    %72 = tpu.matmul %71, %70, %cst_26 {dimension_numbers = #tpu.dot_dimension_numbers<[1], [0], [0], [1], [0, 0, 1, 1], [], []>} : vector<8x72xf32>, vector<72x512xf32>, vector<8x512xf32> -> vector<8x512xf32>
    %cst_27 = arith.constant dense<0.000000e+00> : vector<8xf32>
    %73 = vector.multi_reduction <add>, %72, %cst_27 [1] : vector<8x512xf32> to vector<8xf32>
    %74 = vector.shape_cast %73 : vector<8xf32> to vector<8x1xf32>
    %cst_28 = arith.constant 0.001953125 : f32
    %75 = vector.broadcast %cst_28 : f32 to vector<8x1xf32>
    %76 = arith.mulf %74, %75 : vector<8x1xf32>
    %77 = vector.broadcast %76 : vector<8x1xf32> to vector<8x512xf32>
    %78 = arith.subf %72, %77 : vector<8x512xf32>
    %79 = arith.mulf %78, %78 : vector<8x512xf32>
    %cst_29 = arith.constant dense<0.000000e+00> : vector<8xf32>
    %80 = vector.multi_reduction <add>, %79, %cst_29 [1] : vector<8x512xf32> to vector<8xf32>
    %81 = vector.shape_cast %80 : vector<8xf32> to vector<8x1xf32>
    %cst_30 = arith.constant 0.001953125 : f32
    %82 = vector.broadcast %cst_30 : f32 to vector<8x1xf32>
    %83 = arith.mulf %81, %82 : vector<8x1xf32>
    %cst_31 = arith.constant 9.99999974E-6 : f32
    %84 = vector.broadcast %cst_31 : f32 to vector<8x1xf32>
    %85 = arith.addf %83, %84 : vector<8x1xf32>
    %86 = math.rsqrt %85 : vector<8x1xf32>
    %87 = vector.broadcast %86 : vector<8x1xf32> to vector<8x512xf32>
    %88 = arith.mulf %78, %87 : vector<8x512xf32>
    %c0_32 = arith.constant 0 : index
    %c0_33 = arith.constant 0 : index
    %89 = vector.load %arg3[%c0_32, %c0_33] : memref<8x1xf32, #tpu.memory_space<vmem>>, vector<8x1xf32>
    %90 = vector.broadcast %89 : vector<8x1xf32> to vector<8x512xf32>
    %91 = arith.mulf %88, %90 : vector<8x512xf32>
    %c0_34 = arith.constant 0 : index
    %c0_35 = arith.constant 0 : index
    %92 = vector.load %arg4[%c0_34, %c0_35] : memref<8x1xf32, #tpu.memory_space<vmem>>, vector<8x1xf32>
    %93 = vector.broadcast %92 : vector<8x1xf32> to vector<8x512xf32>
    %94 = arith.addf %91, %93 : vector<8x512xf32>
    %cst_36 = arith.constant 0.000000e+00 : f32
    %95 = vector.broadcast %cst_36 : f32 to vector<8x512xf32>
    %96 = arith.maximumf %94, %95 : vector<8x512xf32>
    %c1_i32_37 = arith.constant 1 : i32
    %97 = tpu.dynamic_rotate %96 by %c1_i32_37 dim 1 : vector<8x512xf32>, i32 -> vector<8x512xf32>
    %98 = arith.mulf %97, %16 : vector<8x512xf32>
    %c511_i32_38 = arith.constant 511 : i32
    %99 = tpu.dynamic_rotate %96 by %c511_i32_38 dim 1 : vector<8x512xf32>, i32 -> vector<8x512xf32>
    %100 = arith.mulf %99, %40 : vector<8x512xf32>
    %c16_i32_39 = arith.constant 16 : i32
    %101 = tpu.dynamic_rotate %98 by %c16_i32_39 dim 1 : vector<8x512xf32>, i32 -> vector<8x512xf32>
    %102 = arith.mulf %101, %28 : vector<8x512xf32>
    %c16_i32_40 = arith.constant 16 : i32
    %103 = tpu.dynamic_rotate %96 by %c16_i32_40 dim 1 : vector<8x512xf32>, i32 -> vector<8x512xf32>
    %104 = arith.mulf %103, %28 : vector<8x512xf32>
    %c16_i32_41 = arith.constant 16 : i32
    %105 = tpu.dynamic_rotate %100 by %c16_i32_41 dim 1 : vector<8x512xf32>, i32 -> vector<8x512xf32>
    %106 = arith.mulf %105, %28 : vector<8x512xf32>
    %c496_i32_42 = arith.constant 496 : i32
    %107 = tpu.dynamic_rotate %98 by %c496_i32_42 dim 1 : vector<8x512xf32>, i32 -> vector<8x512xf32>
    %108 = arith.mulf %107, %52 : vector<8x512xf32>
    %c496_i32_43 = arith.constant 496 : i32
    %109 = tpu.dynamic_rotate %96 by %c496_i32_43 dim 1 : vector<8x512xf32>, i32 -> vector<8x512xf32>
    %110 = arith.mulf %109, %52 : vector<8x512xf32>
    %c496_i32_44 = arith.constant 496 : i32
    %111 = tpu.dynamic_rotate %100 by %c496_i32_44 dim 1 : vector<8x512xf32>, i32 -> vector<8x512xf32>
    %112 = arith.mulf %111, %52 : vector<8x512xf32>
    %113 = tpu.concatenate %102, %104, %106, %98, %96, %100, %108, %110, %112 in 0 : vector<8x512xf32>, vector<8x512xf32>, vector<8x512xf32>, vector<8x512xf32>, vector<8x512xf32>, vector<8x512xf32>, vector<8x512xf32>, vector<8x512xf32>, vector<8x512xf32> -> vector<72x512xf32>
    %c0_45 = arith.constant 0 : index
    %c0_46 = arith.constant 0 : index
    %114 = vector.load %arg5[%c0_45, %c0_46] : memref<8x72xf32, #tpu.memory_space<vmem>>, vector<8x72xf32>
    %cst_47 = arith.constant dense<0.000000e+00> : vector<8x512xf32>
    %115 = tpu.matmul %114, %113, %cst_47 {dimension_numbers = #tpu.dot_dimension_numbers<[1], [0], [0], [1], [0, 0, 1, 1], [], []>} : vector<8x72xf32>, vector<72x512xf32>, vector<8x512xf32> -> vector<8x512xf32>
    %cst_48 = arith.constant dense<0.000000e+00> : vector<8xf32>
    %116 = vector.multi_reduction <add>, %115, %cst_48 [1] : vector<8x512xf32> to vector<8xf32>
    %117 = vector.shape_cast %116 : vector<8xf32> to vector<8x1xf32>
    %cst_49 = arith.constant 0.001953125 : f32
    %118 = vector.broadcast %cst_49 : f32 to vector<8x1xf32>
    %119 = arith.mulf %117, %118 : vector<8x1xf32>
    %120 = vector.broadcast %119 : vector<8x1xf32> to vector<8x512xf32>
    %121 = arith.subf %115, %120 : vector<8x512xf32>
    %122 = arith.mulf %121, %121 : vector<8x512xf32>
    %cst_50 = arith.constant dense<0.000000e+00> : vector<8xf32>
    %123 = vector.multi_reduction <add>, %122, %cst_50 [1] : vector<8x512xf32> to vector<8xf32>
    %124 = vector.shape_cast %123 : vector<8xf32> to vector<8x1xf32>
    %cst_51 = arith.constant 0.001953125 : f32
    %125 = vector.broadcast %cst_51 : f32 to vector<8x1xf32>
    %126 = arith.mulf %124, %125 : vector<8x1xf32>
    %cst_52 = arith.constant 9.99999974E-6 : f32
    %127 = vector.broadcast %cst_52 : f32 to vector<8x1xf32>
    %128 = arith.addf %126, %127 : vector<8x1xf32>
    %129 = math.rsqrt %128 : vector<8x1xf32>
    %130 = vector.broadcast %129 : vector<8x1xf32> to vector<8x512xf32>
    %131 = arith.mulf %121, %130 : vector<8x512xf32>
    %c0_53 = arith.constant 0 : index
    %c0_54 = arith.constant 0 : index
    %132 = vector.load %arg7[%c0_53, %c0_54] : memref<8x1xf32, #tpu.memory_space<vmem>>, vector<8x1xf32>
    %133 = vector.broadcast %132 : vector<8x1xf32> to vector<8x512xf32>
    %134 = arith.mulf %131, %133 : vector<8x512xf32>
    %c0_55 = arith.constant 0 : index
    %c0_56 = arith.constant 0 : index
    %135 = vector.load %arg8[%c0_55, %c0_56] : memref<8x1xf32, #tpu.memory_space<vmem>>, vector<8x1xf32>
    %136 = vector.broadcast %135 : vector<8x1xf32> to vector<8x512xf32>
    %137 = arith.addf %134, %136 : vector<8x512xf32>
    %cst_57 = arith.constant 0.000000e+00 : f32
    %138 = vector.broadcast %cst_57 : f32 to vector<8x512xf32>
    %139 = arith.maximumf %137, %138 : vector<8x512xf32>
    %c1_i32_58 = arith.constant 1 : i32
    %140 = tpu.dynamic_rotate %139 by %c1_i32_58 dim 1 : vector<8x512xf32>, i32 -> vector<8x512xf32>
    %141 = arith.mulf %140, %16 : vector<8x512xf32>
    %c511_i32_59 = arith.constant 511 : i32
    %142 = tpu.dynamic_rotate %139 by %c511_i32_59 dim 1 : vector<8x512xf32>, i32 -> vector<8x512xf32>
    %143 = arith.mulf %142, %40 : vector<8x512xf32>
    %c16_i32_60 = arith.constant 16 : i32
    %144 = tpu.dynamic_rotate %141 by %c16_i32_60 dim 1 : vector<8x512xf32>, i32 -> vector<8x512xf32>
    %145 = arith.mulf %144, %28 : vector<8x512xf32>
    %c16_i32_61 = arith.constant 16 : i32
    %146 = tpu.dynamic_rotate %139 by %c16_i32_61 dim 1 : vector<8x512xf32>, i32 -> vector<8x512xf32>
    %147 = arith.mulf %146, %28 : vector<8x512xf32>
    %c16_i32_62 = arith.constant 16 : i32
    %148 = tpu.dynamic_rotate %143 by %c16_i32_62 dim 1 : vector<8x512xf32>, i32 -> vector<8x512xf32>
    %149 = arith.mulf %148, %28 : vector<8x512xf32>
    %c496_i32_63 = arith.constant 496 : i32
    %150 = tpu.dynamic_rotate %141 by %c496_i32_63 dim 1 : vector<8x512xf32>, i32 -> vector<8x512xf32>
    %151 = arith.mulf %150, %52 : vector<8x512xf32>
    %c496_i32_64 = arith.constant 496 : i32
    %152 = tpu.dynamic_rotate %139 by %c496_i32_64 dim 1 : vector<8x512xf32>, i32 -> vector<8x512xf32>
    %153 = arith.mulf %152, %52 : vector<8x512xf32>
    %c496_i32_65 = arith.constant 496 : i32
    %154 = tpu.dynamic_rotate %143 by %c496_i32_65 dim 1 : vector<8x512xf32>, i32 -> vector<8x512xf32>
    %155 = arith.mulf %154, %52 : vector<8x512xf32>
    %156 = tpu.concatenate %145, %147, %149, %141, %139, %143, %151, %153, %155 in 0 : vector<8x512xf32>, vector<8x512xf32>, vector<8x512xf32>, vector<8x512xf32>, vector<8x512xf32>, vector<8x512xf32>, vector<8x512xf32>, vector<8x512xf32>, vector<8x512xf32> -> vector<72x512xf32>
    %c0_66 = arith.constant 0 : index
    %c0_67 = arith.constant 0 : index
    %157 = vector.load %arg9[%c0_66, %c0_67] : memref<8x72xf32, #tpu.memory_space<vmem>>, vector<8x72xf32>
    %cst_68 = arith.constant dense<0.000000e+00> : vector<8x512xf32>
    %158 = tpu.matmul %157, %156, %cst_68 {dimension_numbers = #tpu.dot_dimension_numbers<[1], [0], [0], [1], [0, 0, 1, 1], [], []>} : vector<8x72xf32>, vector<72x512xf32>, vector<8x512xf32> -> vector<8x512xf32>
    %c0_69 = arith.constant 0 : index
    %c0_70 = arith.constant 0 : index
    %159 = vector.load %arg10[%c0_69, %c0_70] : memref<8x1xf32, #tpu.memory_space<vmem>>, vector<8x1xf32>
    %160 = vector.broadcast %159 : vector<8x1xf32> to vector<8x512xf32>
    %161 = arith.addf %158, %160 : vector<8x512xf32>
    %c0_71 = arith.constant 0 : index
    %c0_72 = arith.constant 0 : index
    %162 = vector.load %arg11[%c0_71, %c0_72] : memref<8x512xf32, #tpu.memory_space<vmem>>, vector<8x512xf32>
    tpu.vector_store %arg11[%c0_71, %c0_72], %161 {strides = array<i32>} : memref<8x512xf32, #tpu.memory_space<vmem>>, vector<8x512xf32>,
    return
  }
}

</mosaic_0001>

<bundles_post_ra>
// kernel: simple_cnn_forward.1
= control target key start
LH: loop header
LB: loop body
LE: loop exit
PB: predicated region body
PF: predicated region fallthrough
CT: control target
= control target key end

     0   :  { %v1094_v2 = vmov 0.0   ;;  %s1095_s19 = smov 127   ;;  %s1096_s24 = smov 1   ;;  %v38_v5 = vlaneseq  ;;  %s1871_s0 = inlined_call_operand.vmem [shape: f32[8,512], index: 0, kind: input, shape index: {}]   ;;  %s1872_s2 = inlined_call_operand.vmem [shape: f32[8,1], index: 2, kind: input, shape index: {}]   ;;  %s1873_s6 = inlined_call_operand.vmem [shape: f32[8,1], index: 6, kind: input, shape index: {}]   ;;  %s1874_s1 = inlined_call_operand.vmem [shape: f32[8,72], index: 1, kind: input, shape index: {}]   ;;  %s1875_s3 = inlined_call_operand.vmem [shape: f32[8,1], index: 3, kind: input, shape index: {}]   ;;  %s1876_s4 = inlined_call_operand.vmem [shape: f32[8,1], index: 4, kind: input, shape index: {}]   ;;  %s1877_s5 = inlined_call_operand.vmem [shape: f32[8,72], index: 5, kind: input, shape index: {}]   ;;  %s1878_s7 = inlined_call_operand.vmem [shape: f32[8,1], index: 7, kind: input, shape index: {}]   ;;  %s1879_s8 = inlined_call_operand.vmem [shape: f32[8,1], index: 8, kind: input, shape index: {}]   ;;  %s1880_s10 = inlined_call_operand.vmem [shape: f32[8,1], index: 10, kind: input, shape index: {}]   ;;  %s1881_s9 = inlined_call_operand.vmem [shape: f32[8,72], index: 9, kind: input, shape index: {}]   ;;  %s1882_s11 = inlined_call_operand.vmem [shape: f32[8,512], index: 11, kind: output, shape index: {}]  }
   0x1   :  { %v1163_v0 = vld [vmem:[%s1871_s0 + $0x18] sm:$0xff]  ;;  %v1168_v1 = vld [vmem:[%s1871_s0 + $0x8] sm:$0xff]  ;;  %336 = vmatprep.mubr.f32.mxu0 %v1094_v2  ;;  %407 = vmatprep.mubr.f32.mxu1 %v1094_v2  ;;  %v1179_v3 = vld [vmem:[%s1871_s0 + $0x10] sm:$0xff]  ;;  %s1098_s25 = smov 16  }
   0x2   :  { %158 = vrot.lane.b32.xlu1 %v1163_v0, %s1095_s19  ;;  %154 = vrot.lane.b32.xlu0 %v1168_v1, %s1095_s19  ;;  %v1184_v4 = vld [vmem:[%s1871_s0] sm:$0xff]  ;;  %s1097_s0 = smov 112   ;;  %v1212_v6 = vand.u32 127, %v38_v5 }
   0x4   :  { %v1215_v7 = vadd.s32 128, %v1212_v6  ;;  %v1218_v8 = vadd.s32 256, %v1212_v6  ;;  %v43_v11 = vand.u32 15, %v1212_v6  ;;  %v1224_v14 = vadd.s32 384, %v1212_v6 }
   0x5   :  { %vm160_vm2 = vcmp.lt.s32.totalorder %v1212_v6, 127  ;;  %vm143_vm5 = vcmp.lt.s32.totalorder %v1212_v6, 1  ;;  %vm226_vm11 = vcmp.lt.s32.totalorder %v1212_v6, 112  ;;  %vm177_vm13 = vcmp.lt.s32.totalorder %v1212_v6, 16 }
   0x6   :  { %156 = vrot.lane.b32.xlu0 %v1179_v3, %s1095_s19  ;;  %152 = vrot.lane.b32.xlu1 %v1184_v4, %s1095_s19  ;;  %v44_v9 = vand.u32 15, %v1215_v7  ;;  %v45_v10 = vand.u32 15, %v1218_v8  ;;  %v91_v15 = vadd.s32 1, %v43_v11  ;;  %v46_v19 = vand.u32 15, %v1224_v14 }
   0x7   :  { %v51_v35 = vadd.s32 4294967295, %v43_v11  ;;  %v48_v58 = vand.u32 255, %v1215_v7  ;;  %v50_v63 = vand.u32 255, %v1224_v14 }
   0x8   :  { %v92_v12 = vadd.s32 1, %v44_v9  ;;  %v93_v13 = vadd.s32 1, %v45_v10  ;;  %v52_v18 = vadd.s32 4294967295, %v44_v9  ;;  %v53_v24 = vadd.s32 4294967295, %v45_v10 }
   0x9   :  { %vm99_vm3 = vcmp.lt.s32.totalorder %v91_v15, 16  ;;  %v94_v25 = vadd.s32 1, %v46_v19  ;;  %v54_v36 = vadd.s32 4294967295, %v46_v19  ;;  %vm55_vm8 = vcmp.ge.s32.totalorder %v51_v35, 0 }
   0xa   :  { %135 = vrot.lane.b32.xlu0 %v1184_v4, %s1096_s24  ;;  %137 = vrot.lane.b32.xlu1 %v1168_v1, %s1096_s24  ;;  %vm100_vm0 = vcmp.lt.s32.totalorder %v92_v12, 16  ;;  %vm101_vm1 = vcmp.lt.s32.totalorder %v93_v13, 16  ;;  %vm56_vm4 = vcmp.ge.s32.totalorder %v52_v18, 0  ;;  %v1248_v31 = vsel %vm99_vm3, 1.0, %v1094_v2 }
   0xb   :  { %v1229_v20 = vsel %vm100_vm0, 1.0, %v1094_v2  ;;  %v1232_v21 = vsel %vm101_vm1, 1.0, %v1094_v2  ;;  %v1251_v32 = vsel %vm56_vm4, 1.0, %v1094_v2  ;;  %vm57_vm6 = vcmp.ge.s32.totalorder %v53_v24, 0 }
   0xc   :  { %vm102_vm7 = vcmp.lt.s32.totalorder %v94_v25, 16  ;;  %v1268_v41 = vsel %vm57_vm6, 1.0, %v1094_v2  ;;  %vm58_vm9 = vcmp.ge.s32.totalorder %v54_v36, 0  ;;  %v1290_v50 = vsel %vm55_vm8, 1.0, %v1094_v2 }
   0xd   :  { %v1271_v42 = vsel %vm102_vm7, 1.0, %v1094_v2  ;;  %v1293_v51 = vsel %vm58_vm9, 1.0, %v1094_v2  ;;  %v112_v60 = vadd.s32 16, %v48_v58  ;;  %v114_v11 = vadd.s32 16, %v50_v63 }
   0xe   :  { %139 = vrot.lane.b32.xlu0 %v1179_v3, %s1096_s24  ;;  %141 = vrot.lane.b32.xlu1 %v1163_v0, %s1096_s24  ;;  %v47_v25 = vand.u32 255, %v1212_v6  ;;  %vm268_vm0 = vcmask 588800  }
   0xf   :  { %vm120_vm10 = vcmp.lt.s32.totalorder %v112_v60, 256  ;;  %vm122_vm12 = vcmp.lt.s32.totalorder %v114_v11, 256 }
  0x10   :  { %v1337_v10 = vsel %vm120_vm10, 1.0, %v1094_v2  ;;  %v1350_v19 = vsel %vm122_vm12, 1.0, %v1094_v2 }
  0x12   :  { %237 = vrot.lane.b32.xlu0 %v1168_v1, %s1097_s0  ;;  %239 = vrot.lane.b32.xlu1 %v1179_v3, %s1097_s0 }
  0x16   :  { %235 = vrot.lane.b32.xlu0 %v1184_v4, %s1097_s0  ;;  %241 = vrot.lane.b32.xlu1 %v1163_v0, %s1097_s0 }
  0x1a   :  { %186 = vrot.lane.b32.xlu1 %v1184_v4, %s1098_s25  ;;  %192 = vrot.lane.b32.xlu0 %v1163_v0, %s1098_s25 }
  0x1e   :  { %188 = vrot.lane.b32.xlu1 %v1168_v1, %s1098_s25 }
  0x74   :  { %v159_v16 = vpop.permute.xlu1 %158  ;;  %v155_v17 = vpop.permute.xlu0 %154 }
  0x78   :  { %v157_v22 = vpop.permute.xlu0 %156  ;;  %v153_v23 = vpop.permute.xlu1 %152 }
  0x79   :  { %v161_v26 = vsel %vm160_vm2, %v157_v22, %v159_v16  ;;  %v162_v27 = vsel %vm160_vm2, %v155_v17, %v157_v22  ;;  %v163_v30 = vsel %vm160_vm2, %v153_v23, %v155_v17  ;;  %v164_v40 = vsel %vm160_vm2, %v159_v16, %v153_v23 }
  0x7a   :  { %v1239_v28 = vmul.f32 %v162_v27, %v1229_v20  ;;  %v1242_v29 = vmul.f32 %v161_v26, %v1232_v21  ;;  %v1260_v38 = vmul.f32 %v163_v30, %v1248_v31  ;;  %v1283_v47 = vmul.f32 %v164_v40, %v1271_v42 }
  0x7b   :  { %v71_v40 = vadd.s32 4294967280, %v47_v25 }
  0x7c   :  { %253 = vrot.lane.b32.xlu0 %v1239_v28, %s1097_s0  ;;  %v136_v33 = vpop.permute.xlu0 %135  ;;  %255 = vrot.lane.b32.xlu1 %v1242_v29, %s1097_s0  ;;  %v138_v34 = vpop.permute.xlu1 %137 }
  0x7d   :  { %v146_v37 = vsel %vm143_vm5, %v136_v33, %v138_v34  ;;  %vm75_vm14 = vcmp.ge.s32.totalorder %v71_v40, 0 }
  0x7e   :  { %v1263_v39 = vmul.f32 %v146_v37, %v1251_v32 }
  0x80   :  { %v140_v43 = vpop.permute.xlu0 %139  ;;  %251 = vrot.lane.b32.xlu0 %v1260_v38, %s1097_s0  ;;  %220 = vrot.lane.b32.xlu1 %v1263_v39, %s1097_s0  ;;  %v142_v44 = vpop.permute.xlu1 %141 }
  0x81   :  { %v145_v45 = vsel %vm143_vm5, %v138_v34, %v140_v43  ;;  %v144_v48 = vsel %vm143_vm5, %v140_v43, %v142_v44  ;;  %v147_v49 = vsel %vm143_vm5, %v142_v44, %v136_v33 }
  0x82   :  { %v1280_v46 = vmul.f32 %v145_v45, %v1268_v41  ;;  %v1300_v52 = vmul.f32 %v147_v49, %v1290_v50  ;;  %v1303_v53 = vmul.f32 %v144_v48, %v1293_v51  ;;  %v49_v49 = vand.u32 255, %v1218_v8 }
  0x84   :  { %257 = vrot.lane.b32.xlu1 %v1283_v47, %s1097_s0  ;;  %222 = vrot.lane.b32.xlu0 %v1280_v46, %s1097_s0  ;;  %v240_v54 = vpop.permute.xlu1 %239  ;;  %v238_v56 = vpop.permute.xlu0 %237  ;;  %v73_v8 = vadd.s32 4294967280, %v49_v49 }
  0x85   :  { %v244_v12 = vsel %vm226_vm11, %v238_v56, %v240_v54 }
  0x86   :  { %v248_v17 = vmul.f32 %v244_v12, %v1337_v10  ;;  %vm77_vm15 = vcmp.ge.s32.totalorder %v73_v8, 0 }
  0x88   :  { %218 = vrot.lane.b32.xlu0 %v1300_v52, %s1097_s0  ;;  %224 = vrot.lane.b32.xlu1 %v1303_v53, %s1097_s0  ;;  %v242_v55 = vpop.permute.xlu1 %241  ;;  %v236_v59 = vpop.permute.xlu0 %235 }
  0x89   :  { %v245_v18 = vsel %vm226_vm11, %v236_v59, %v238_v56  ;;  %v246_v24 = vsel %vm226_vm11, %v242_v55, %v236_v59  ;;  %v243_v48 = vsel %vm226_vm11, %v240_v54, %v242_v55 }
  0x8a   :  { %v250_v37 = vmul.f32 %v246_v24, %v1350_v19 }
  0x8c   :  { %202 = vrot.lane.b32.xlu0 %v1260_v38, %s1098_s25  ;;  %208 = vrot.lane.b32.xlu1 %v1283_v47, %s1098_s25  ;;  %v1327_v57 = vpop.permute.xlu1 %186  ;;  %v1330_v61 = vpop.permute.xlu0 %192 }
  0x90   :  { %204 = vrot.lane.b32.xlu0 %v1239_v28, %s1098_s25  ;;  %175 = vrot.lane.b32.xlu1 %v1303_v53, %s1098_s25  ;;  %v1332_v62 = vpop.permute.xlu1 %188 }
  0x94   :  { %169 = vrot.lane.b32.xlu0 %v1300_v52, %s1098_s25  ;;  %171 = vrot.lane.b32.xlu1 %v1263_v39, %s1098_s25 }
  0x98   :  { %206 = vrot.lane.b32.xlu0 %v1242_v29, %s1098_s25  ;;  %173 = vrot.lane.b32.xlu1 %v1280_v46, %s1098_s25 }
  0x9c   :  { %190 = vrot.lane.b32.xlu0 %v1179_v3, %s1098_s25 }
  0xee   :  { %v254_v5 = vpop.permute.xlu0 %253  ;;  %v256_v9 = vpop.permute.xlu1 %255 }
  0xef   :  { %v260_v7 = vsel %vm226_vm11, %v254_v5, %v256_v9 }
  0xf0   :  { %v264_v13 = vmul.f32 %v260_v7, %v1337_v10 }
  0xf2   :  { %v252_v15 = vpop.permute.xlu0 %251  ;;  %286 = vmatprep.subr.mxu0 %v264_v13  ;;  %v221_v14 = vpop.permute.xlu1 %220 }
  0xf3   :  { %v261_v16 = vsel %vm226_vm11, %v252_v15, %v254_v5 }
  0xf4   :  { %287 = vmatpush1.msra.mxu0 %v261_v16 }
  0xf5   :  { %288 = vmatprep.subr.mxu0 %v248_v17 }
  0xf6   :  { %v223_v22 = vpop.permute.xlu0 %222  ;;  %289 = vmatpush1.msra.mxu0 %v245_v18  ;;  %v258_v23 = vpop.permute.xlu1 %257 }
  0xf7   :  { %v228_v26 = vsel %vm226_vm11, %v221_v14, %v223_v22  ;;  %v262_v27 = vsel %vm226_vm11, %v258_v23, %v252_v15  ;;  %v259_v36 = vsel %vm226_vm11, %v256_v9, %v258_v23 }
  0xf8   :  { %v232_v30 = vmul.f32 %v228_v26, %v1337_v10  ;;  %v266_v33 = vmul.f32 %v262_v27, %v1350_v19  ;;  %v1099_v27 = vmov 0  }
  0xf9   :  { %1088 = vset.pattern.permute.xlu0 %v1099_v27  ;;  %1089 = vset.pattern.permute.xlu1 %v1099_v27 }
  0xfa   :  { %v219_v34 = vpop.permute.xlu0 %218  ;;  %290 = vmatprep.subr.mxu0 %v232_v30  ;;  %357 = vmatprep.subr.mxu1 %v266_v33  ;;  %v225_v35 = vpop.permute.xlu1 %224  ;;  %v440_v30 = vld [vmem:[%s1875_s3] sm:$0xff] }
  0xfb   :  { %v230_v43 = vsel %vm226_vm11, %v225_v35, %v219_v34  ;;  %358 = vmatpush1.msra.mxu1 %v259_v36  ;;  %v229_v44 = vsel %vm226_vm11, %v219_v34, %v221_v14  ;;  %v227_v59 = vsel %vm226_vm11, %v223_v22, %v225_v35 }
  0xfc   :  { %v234_v45 = vmul.f32 %v230_v43, %v1350_v19  ;;  %291 = vmatpush1.msra.mxu0 %v229_v44  ;;  %359 = vmatprep.subr.mxu1 %v250_v37 }
  0xfd   :  { %292 = vmatprep.subr.mxu0 %v1239_v28  ;;  %360 = vmatpush1.msra.mxu1 %v243_v48 }
  0xfe   :  { %v203_v56 = vpop.permute.xlu0 %202  ;;  %293 = vmatpush1.msra.mxu0 %v1260_v38  ;;  %361 = vmatprep.subr.mxu1 %v234_v45  ;;  %v209_v58 = vpop.permute.xlu1 %208  ;;  %v1385_v38 = vsel %vm75_vm14, 1.0, %v1094_v2 }
  0xff   :  { %294 = vmatprep.subr.mxu0 %v1168_v1  ;;  %362 = vmatpush1.msra.mxu1 %v227_v59  ;;  %v213_v28 = vsel %vm177_vm13, %v209_v58, %v203_v56  ;;  %v197_v1 = vsel %vm177_vm13, %v1330_v61, %v1327_v57  ;;  %v450_v59 = vld [vmem:[%s1876_s4] sm:$0xff] }
 0x100   :  { %295 = vmatpush1.msra.mxu0 %v1184_v4  ;;  %363 = vmatprep.subr.mxu1 %v1283_v47  ;;  %v214_v47 = vmul.f32 %v213_v28, %v1385_v38 }
 0x101   :  { %296 = vmatprep.subr.mxu0 %v1263_v39  ;;  %364 = vmatpush1.msra.mxu1 %v1242_v29  ;;  %v198_v39 = vmul.f32 %v197_v1, %v1385_v38 }
 0x102   :  { %v205_v54 = vpop.permute.xlu0 %204  ;;  %297 = vmatpush1.msra.mxu0 %v1300_v52  ;;  %365 = vmatprep.subr.mxu1 %v1163_v0  ;;  %v176_v4 = vpop.permute.xlu1 %175  ;;  %v196_v0 = vsel %vm177_vm13, %v1327_v57, %v1332_v62  ;;  %v1413_v57 = vsel %vm77_vm15, 1.0, %v1094_v2 }
 0x103   :  { %366 = vmatpush1.msra.mxu1 %v1179_v3  ;;  %v212_v29 = vsel %vm177_vm13, %v203_v56, %v205_v54 }
 0x104   :  { %298 = vmatprep.subr.mxu0 %v212_v29  ;;  %367 = vmatprep.subr.mxu1 %v1303_v53 }
 0x105   :  { %299 = vmatpush1.msra.mxu0 %v214_v47  ;;  %368 = vmatpush1.msra.mxu1 %v1280_v46  ;;  %v267_v46 = vld [vmem:[%s1874_s1] sm:$0xff] }
 0x106   :  { %v170_v52 = vpop.permute.xlu0 %169  ;;  %300 = vmatprep.subr.mxu0 %v196_v0  ;;  %v172_v3 = vpop.permute.xlu1 %171 }
 0x107   :  { %v181_v55 = vsel %vm177_vm13, %v176_v4, %v170_v52  ;;  %301 = vmatpush1.msra.mxu0 %v198_v39  ;;  %v180_v53 = vsel %vm177_vm13, %v170_v52, %v172_v3 }
 0x108   :  { %v182_v60 = vmul.f32 %v181_v55, %v1385_v38  ;;  %302 = vmatprep.subr.mxu0 %v180_v53 }
 0x10a   :  { %v207_v63 = vpop.permute.xlu0 %206  ;;  %303 = vmatpush1.msra.mxu0 %v182_v60  ;;  %v174_v7 = vpop.permute.xlu1 %173 }
 0x10b   :  { %v211_v5 = vsel %vm177_vm13, %v205_v54, %v207_v63  ;;  %v210_v9 = vsel %vm177_vm13, %v207_v63, %v209_v58  ;;  %1076 = vmatmul.mubr.msk.f32.vlgmr.msra.gmra.mxu0 %vm268_vm0, %v267_v46  ;;  %v179_v13 = vsel %vm177_vm13, %v172_v3, %v174_v7  ;;  %v178_v18 = vsel %vm177_vm13, %v174_v7, %v176_v4 }
 0x10c   :  { %v216_v11 = vmul.f32 %v211_v5, %v1413_v57  ;;  %369 = vmatprep.subr.mxu1 %v210_v9  ;;  %660 = vmatprep.mubr.f32.mxu0 %v1094_v2  ;;  %v184_v17 = vmul.f32 %v179_v13, %v1413_v57 }
 0x10e   :  { %v191_v12 = vpop.permute.xlu0 %190  ;;  %370 = vmatpush1.msra.mxu1 %v216_v11 }
 0x10f   :  { %v195_v15 = vsel %vm177_vm13, %v1332_v62, %v191_v12  ;;  %v194_v14 = vsel %vm177_vm13, %v191_v12, %v1330_v61 }
 0x110   :  { %v200_v16 = vmul.f32 %v195_v15, %v1413_v57  ;;  %371 = vmatprep.subr.mxu1 %v194_v14 }
 0x112   :  { %372 = vmatpush1.msra.mxu1 %v200_v16 }
 0x113   :  { %373 = vmatprep.subr.mxu1 %v178_v18 }
 0x114   :  { %374 = vmatpush1.msra.mxu1 %v184_v17 }
 0x115   :  { %1077 = vmatmul.mubr.msk.f32.vlgmr.msra.gmra.mxu1 %vm268_vm0, %v267_v46 }
 0x116   :  { %731 = vmatprep.mubr.f32.mxu1 %v1094_v2 }
 0x1cb   :  { %v338_v62 = vpop.f32.mrf.mxu0 }
 0x1cd   :  { %v340_v22 = vpop.f32.mrf.mxu0 }
 0x1ce   :  { %v414_v23 = vadd.f32 %v340_v22, %v338_v62 }
 0x1d5   :  { %v409_v24 = vpop.f32.mrf.mxu1 }
 0x1d6   :  { %v415_v61 = vadd.f32 %v414_v23, %v409_v24 }
 0x1d7   :  { %v411_v25 = vpop.f32.mrf.mxu1 }
 0x1d8   :  { %v416_v26 = vadd.f32 %v415_v61, %v411_v25 }
 0x1da   :  { %417 = vadd.xlane.f32.xlu0 %v416_v26 }
 0x1f0   :  { %443 = vperm.xlu0 %1088, %v440_v30  }
 0x263   :  { %v418_v33 = vpop.xlane.xlu0 %417 }
 0x264   :  { %v419_v34 = vmul.f32 0.001953125, %v418_v33 }
 0x266   :  { %v420_v35 = vsub.f32 %v338_v62, %v419_v34  ;;  %v421_v36 = vsub.f32 %v340_v22, %v419_v34  ;;  %v422_v37 = vsub.f32 %v409_v24, %v419_v34  ;;  %v423_v40 = vsub.f32 %v411_v25, %v419_v34 }
 0x268   :  { %v424_v43 = vmul.f32 %v420_v35, %v420_v35  ;;  %v425_v44 = vmul.f32 %v421_v36, %v421_v36  ;;  %v426_v45 = vmul.f32 %v422_v37, %v422_v37  ;;  %v427_v49 = vmul.f32 %v423_v40, %v423_v40 }
 0x26a   :  { %v428_v48 = vadd.f32 %v425_v44, %v424_v43 }
 0x26b   :  { %v444_v4 = vpop.permute.xlu0 %443 }
 0x26c   :  { %v429_v56 = vadd.f32 %v428_v48, %v426_v45 }
 0x26e   :  { %v430_v58 = vadd.f32 %v429_v56, %v427_v49 }
 0x270   :  { %431 = vadd.xlane.f32.xlu1 %v430_v58 }
 0x281   :  { %453 = vperm.xlu1 %1089, %v450_v59  }
 0x2f9   :  { %v432_v28 = vpop.xlane.xlu1 %431 }
 0x2fa   :  { %v433_v8 = vmul.f32 0.001953125, %v432_v28 }
 0x2fc   :  { %v434_v1 = vadd.f32 1e-05, %v433_v8 }
 0x2fd   :  { %v454_v39 = vpop.permute.xlu1 %453 }
 0x2fe   :  { %1090 = vrsqrt.f32 %v434_v1 }
 0x30b   :  { %v1091_v54 = vpop.eup %1090 }
 0x30c   :  { %v437_v47 = vmul.f32 %v1091_v54, %v421_v36  ;;  %v438_v29 = vmul.f32 %v1091_v54, %v422_v37  ;;  %v436_v0 = vmul.f32 %v1091_v54, %v420_v35  ;;  %v439_v52 = vmul.f32 %v1091_v54, %v423_v40 }
 0x30e   :  { %v447_v3 = vmul.f32 %v444_v4, %v437_v47  ;;  %v448_v55 = vmul.f32 %v444_v4, %v438_v29  ;;  %v446_v46 = vmul.f32 %v444_v4, %v436_v0  ;;  %v449_v63 = vmul.f32 %v444_v4, %v439_v52 }
 0x310   :  { %v457_v53 = vadd.f32 %v454_v39, %v447_v3  ;;  %v458_v60 = vadd.f32 %v454_v39, %v448_v55  ;;  %v456_v11 = vadd.f32 %v454_v39, %v446_v46  ;;  %v459_v7 = vadd.f32 %v454_v39, %v449_v63 }
 0x312   :  { %v1442_v5 = vmax.f32 %v457_v53, 0.0  ;;  %v1444_v9 = vmax.f32 %v458_v60, 0.0  ;;  %v1454_v12 = vmax.f32 %v456_v11, 0.0  ;;  %v1456_v13 = vmax.f32 %v459_v7, 0.0 }
 0x314   :  { %468 = vrot.lane.b32.xlu0 %v1444_v9, %s1096_s24  ;;  %482 = vrot.lane.b32.xlu1 %v1442_v5, %s1095_s19 }
 0x318   :  { %562 = vrot.lane.b32.xlu0 %v1442_v5, %s1097_s0  ;;  %484 = vrot.lane.b32.xlu1 %v1444_v9, %s1095_s19 }
 0x31c   :  { %486 = vrot.lane.b32.xlu1 %v1456_v13, %s1095_s19  ;;  %560 = vrot.lane.b32.xlu0 %v1454_v12, %s1097_s0 }
 0x320   :  { %518 = vrot.lane.b32.xlu0 %v1456_v13, %s1098_s25  ;;  %480 = vrot.lane.b32.xlu1 %v1454_v12, %s1095_s19 }
 0x324   :  { %464 = vrot.lane.b32.xlu1 %v1454_v12, %s1096_s24 }
 0x328   :  { %466 = vrot.lane.b32.xlu1 %v1442_v5, %s1096_s24 }
 0x32c   :  { %470 = vrot.lane.b32.xlu1 %v1456_v13, %s1096_s24 }
 0x330   :  { %564 = vrot.lane.b32.xlu1 %v1444_v9, %s1097_s0 }
 0x334   :  { %566 = vrot.lane.b32.xlu1 %v1456_v13, %s1097_s0 }
 0x338   :  { %512 = vrot.lane.b32.xlu1 %v1454_v12, %s1098_s25 }
 0x33c   :  { %514 = vrot.lane.b32.xlu1 %v1442_v5, %s1098_s25 }
 0x386   :  { %v483_v15 = vpop.permute.xlu1 %482  ;;  %v469_v26 = vpop.permute.xlu0 %468 }
 0x38a   :  { %v485_v14 = vpop.permute.xlu1 %484  ;;  %v563_v56 = vpop.permute.xlu0 %562 }
 0x38b   :  { %v489_v16 = vsel %vm160_vm2, %v483_v15, %v485_v14 }
 0x38c   :  { %v1483_v17 = vmul.f32 %v489_v16, %v1229_v20 }
 0x38e   :  { %v487_v18 = vpop.permute.xlu1 %486  ;;  %578 = vrot.lane.b32.xlu0 %v1483_v17, %s1097_s0  ;;  %v561_v59 = vpop.permute.xlu0 %560 }
 0x38f   :  { %v488_v62 = vsel %vm160_vm2, %v485_v14, %v487_v18  ;;  %v570_v55 = vsel %vm226_vm11, %v561_v59, %v563_v56 }
 0x390   :  { %v1490_v22 = vmul.f32 %v488_v62, %v1232_v21 }
 0x392   :  { %580 = vrot.lane.b32.xlu1 %v1490_v22, %s1097_s0  ;;  %v481_v23 = vpop.permute.xlu1 %480  ;;  %v1556_v8 = vpop.permute.xlu0 %518 }
 0x393   :  { %v490_v24 = vsel %vm160_vm2, %v481_v23, %v483_v15  ;;  %v491_v36 = vsel %vm160_vm2, %v487_v18, %v481_v23 }
 0x394   :  { %v1497_v61 = vmul.f32 %v490_v24, %v1248_v31  ;;  %v1520_v43 = vmul.f32 %v491_v36, %v1271_v42 }
 0x396   :  { %576 = vrot.lane.b32.xlu0 %v1497_v61, %s1097_s0  ;;  %v465_v25 = vpop.permute.xlu1 %464 }
 0x39a   :  { %v467_v27 = vpop.permute.xlu1 %466 }
 0x39b   :  { %v473_v30 = vsel %vm143_vm5, %v467_v27, %v469_v26  ;;  %v474_v33 = vsel %vm143_vm5, %v465_v25, %v467_v27 }
 0x39c   :  { %v1506_v34 = vmul.f32 %v474_v33, %v1251_v32  ;;  %v1509_v35 = vmul.f32 %v473_v30, %v1268_v41 }
 0x39e   :  { %546 = vrot.lane.b32.xlu1 %v1506_v34, %s1097_s0  ;;  %548 = vrot.lane.b32.xlu0 %v1509_v35, %s1097_s0  ;;  %v471_v37 = vpop.permute.xlu1 %470 }
 0x39f   :  { %v475_v40 = vsel %vm143_vm5, %v471_v37, %v465_v25  ;;  %v472_v45 = vsel %vm143_vm5, %v469_v26, %v471_v37 }
 0x3a0   :  { %v1523_v44 = vmul.f32 %v475_v40, %v1290_v50  ;;  %v1532_v48 = vmul.f32 %v472_v45, %v1293_v51 }
 0x3a2   :  { %582 = vrot.lane.b32.xlu1 %v1520_v43, %s1097_s0  ;;  %544 = vrot.lane.b32.xlu0 %v1523_v44, %s1097_s0  ;;  %v565_v49 = vpop.permute.xlu1 %564 }
 0x3a3   :  { %v569_v29 = vsel %vm226_vm11, %v563_v56, %v565_v49 }
 0x3a4   :  { %v573_v52 = vmul.f32 %v569_v29, %v1337_v10 }
 0x3a6   :  { %528 = vrot.lane.b32.xlu0 %v1497_v61, %s1098_s25  ;;  %550 = vrot.lane.b32.xlu1 %v1532_v48, %s1097_s0  ;;  %v567_v58 = vpop.permute.xlu1 %566 }
 0x3a7   :  { %v571_v15 = vsel %vm226_vm11, %v567_v58, %v561_v59  ;;  %v568_v27 = vsel %vm226_vm11, %v565_v49, %v567_v58  ;;  %v592_v59 = vld [vmem:[%s1877_s5] sm:$0xff] }
 0x3a8   :  { %v575_v62 = vmul.f32 %v571_v15, %v1350_v19 }
 0x3aa   :  { %530 = vrot.lane.b32.xlu0 %v1483_v17, %s1098_s25  ;;  %534 = vrot.lane.b32.xlu1 %v1520_v43, %s1098_s25  ;;  %v1554_v28 = vpop.permute.xlu1 %512 }
 0x3ab   :  { %v523_v33 = vsel %vm177_vm13, %v1556_v8, %v1554_v28 }
 0x3ac   :  { %v524_v37 = vmul.f32 %v523_v33, %v1385_v38 }
 0x3ae   :  { %496 = vrot.lane.b32.xlu0 %v1523_v44, %s1098_s25  ;;  %502 = vrot.lane.b32.xlu1 %v1532_v48, %s1098_s25  ;;  %v1558_v1 = vpop.permute.xlu1 %514 }
 0x3af   :  { %v522_v45 = vsel %vm177_vm13, %v1554_v28, %v1558_v1 }
 0x3b2   :  { %532 = vrot.lane.b32.xlu0 %v1490_v22, %s1098_s25  ;;  %498 = vrot.lane.b32.xlu1 %v1506_v34, %s1098_s25 }
 0x3b6   :  { %516 = vrot.lane.b32.xlu0 %v1444_v9, %s1098_s25  ;;  %500 = vrot.lane.b32.xlu1 %v1509_v35, %s1098_s25 }
 0x400   :  { %v579_v54 = vpop.permute.xlu0 %578 }
 0x404   :  { %v581_v4 = vpop.permute.xlu1 %580 }
 0x405   :  { %v585_v47 = vsel %vm226_vm11, %v579_v54, %v581_v4 }
 0x406   :  { %v589_v39 = vmul.f32 %v585_v47, %v1337_v10 }
 0x408   :  { %v577_v0 = vpop.permute.xlu0 %576  ;;  %610 = vmatprep.subr.mxu0 %v589_v39 }
 0x409   :  { %v586_v3 = vsel %vm226_vm11, %v577_v0, %v579_v54 }
 0x40a   :  { %611 = vmatpush1.msra.mxu0 %v586_v3 }
 0x40b   :  { %612 = vmatprep.subr.mxu0 %v573_v52 }
 0x40c   :  { %613 = vmatpush1.msra.mxu0 %v570_v55 }
 0x410   :  { %v549_v53 = vpop.permute.xlu0 %548  ;;  %v547_v60 = vpop.permute.xlu1 %546 }
 0x411   :  { %v553_v46 = vsel %vm226_vm11, %v547_v60, %v549_v53 }
 0x412   :  { %v557_v63 = vmul.f32 %v553_v46, %v1337_v10  ;;  %v764_v46 = vld [vmem:[%s1878_s7] sm:$0xff] }
 0x414   :  { %v545_v11 = vpop.permute.xlu0 %544  ;;  %614 = vmatprep.subr.mxu0 %v557_v63  ;;  %v583_v7 = vpop.permute.xlu1 %582 }
 0x415   :  { %v554_v14 = vsel %vm226_vm11, %v545_v11, %v547_v60  ;;  %v587_v16 = vsel %vm226_vm11, %v583_v7, %v577_v0  ;;  %v584_v23 = vsel %vm226_vm11, %v581_v4, %v583_v7 }
 0x416   :  { %v591_v18 = vmul.f32 %v587_v16, %v1350_v19  ;;  %615 = vmatpush1.msra.mxu0 %v554_v14 }
 0x417   :  { %616 = vmatprep.subr.mxu0 %v1483_v17 }
 0x418   :  { %v529_v24 = vpop.permute.xlu0 %528  ;;  %617 = vmatpush1.msra.mxu0 %v1497_v61  ;;  %681 = vmatprep.subr.mxu1 %v591_v18  ;;  %v551_v25 = vpop.permute.xlu1 %550 }
 0x419   :  { %v555_v26 = vsel %vm226_vm11, %v551_v25, %v545_v11  ;;  %618 = vmatprep.subr.mxu0 %v1442_v5  ;;  %682 = vmatpush1.msra.mxu1 %v584_v23  ;;  %v552_v61 = vsel %vm226_vm11, %v549_v53, %v551_v25 }
 0x41a   :  { %v559_v17 = vmul.f32 %v555_v26, %v1350_v19  ;;  %619 = vmatpush1.msra.mxu0 %v1454_v12  ;;  %683 = vmatprep.subr.mxu1 %v575_v62 }
 0x41b   :  { %620 = vmatprep.subr.mxu0 %v1506_v34  ;;  %684 = vmatpush1.msra.mxu1 %v568_v27  ;;  %v774_v27 = vld [vmem:[%s1879_s8] sm:$0xff] }
 0x41c   :  { %v531_v30 = vpop.permute.xlu0 %530  ;;  %621 = vmatpush1.msra.mxu0 %v1523_v44  ;;  %685 = vmatprep.subr.mxu1 %v559_v17  ;;  %v535_v5 = vpop.permute.xlu1 %534 }
 0x41d   :  { %v539_v12 = vsel %vm177_vm13, %v535_v5, %v529_v24  ;;  %686 = vmatpush1.msra.mxu1 %v552_v61  ;;  %v538_v34 = vsel %vm177_vm13, %v529_v24, %v531_v30 }
 0x41e   :  { %v540_v36 = vmul.f32 %v539_v12, %v1385_v38  ;;  %622 = vmatprep.subr.mxu0 %v538_v34  ;;  %687 = vmatprep.subr.mxu1 %v1520_v43 }
 0x41f   :  { %688 = vmatpush1.msra.mxu1 %v1490_v22 }
 0x420   :  { %v497_v40 = vpop.permute.xlu0 %496  ;;  %623 = vmatpush1.msra.mxu0 %v540_v36  ;;  %689 = vmatprep.subr.mxu1 %v1456_v13  ;;  %v503_v44 = vpop.permute.xlu1 %502 }
 0x421   :  { %624 = vmatprep.subr.mxu0 %v522_v45  ;;  %690 = vmatpush1.msra.mxu1 %v1444_v9  ;;  %v507_v43 = vsel %vm177_vm13, %v503_v44, %v497_v40 }
 0x422   :  { %625 = vmatpush1.msra.mxu0 %v524_v37  ;;  %691 = vmatprep.subr.mxu1 %v1532_v48  ;;  %v508_v13 = vmul.f32 %v507_v43, %v1385_v38 }
 0x423   :  { %692 = vmatpush1.msra.mxu1 %v1509_v35 }
 0x424   :  { %v533_v22 = vpop.permute.xlu0 %532  ;;  %v499_v49 = vpop.permute.xlu1 %498 }
 0x425   :  { %v537_v56 = vsel %vm177_vm13, %v531_v30, %v533_v22  ;;  %v506_v58 = vsel %vm177_vm13, %v497_v40, %v499_v49  ;;  %v536_v9 = vsel %vm177_vm13, %v533_v22, %v535_v5 }
 0x426   :  { %v542_v48 = vmul.f32 %v537_v56, %v1413_v57  ;;  %626 = vmatprep.subr.mxu0 %v506_v58  ;;  %693 = vmatprep.subr.mxu1 %v536_v9 }
 0x427   :  { %627 = vmatpush1.msra.mxu0 %v508_v13 }
 0x428   :  { %v517_v35 = vpop.permute.xlu0 %516  ;;  %694 = vmatpush1.msra.mxu1 %v542_v48  ;;  %v501_v28 = vpop.permute.xlu1 %500  ;;  %1078 = vmatmul.mubr.msk.f32.vlgmr.msra.gmra.mxu0 %vm268_vm0, %v592_v59 }
 0x429   :  { %v521_v54 = vsel %vm177_vm13, %v1558_v1, %v517_v35  ;;  %v505_v4 = vsel %vm177_vm13, %v499_v49, %v501_v28  ;;  %v520_v47 = vsel %vm177_vm13, %v517_v35, %v1556_v8  ;;  %990 = vmatprep.mubr.f32.mxu0 %v1094_v2  ;;  %v504_v0 = vsel %vm177_vm13, %v501_v28, %v503_v44 }
 0x42a   :  { %v526_v29 = vmul.f32 %v521_v54, %v1413_v57  ;;  %695 = vmatprep.subr.mxu1 %v520_v47  ;;  %v510_v39 = vmul.f32 %v505_v4, %v1413_v57 }
 0x42c   :  { %696 = vmatpush1.msra.mxu1 %v526_v29 }
 0x42d   :  { %697 = vmatprep.subr.mxu1 %v504_v0 }
 0x42e   :  { %698 = vmatpush1.msra.mxu1 %v510_v39 }
 0x42f   :  { %1079 = vmatmul.mubr.msk.f32.vlgmr.msra.gmra.mxu1 %vm268_vm0, %v592_v59 }
 0x430   :  { %1061 = vmatprep.mubr.f32.mxu1 %v1094_v2 }
 0x4e8   :  { %v662_v1 = vpop.f32.mrf.mxu0 }
 0x4ea   :  { %v664_v52 = vpop.f32.mrf.mxu0 }
 0x4eb   :  { %v738_v8 = vadd.f32 %v664_v52, %v662_v1 }
 0x4ef   :  { %v733_v3 = vpop.f32.mrf.mxu1 }
 0x4f0   :  { %v739_v55 = vadd.f32 %v738_v8, %v733_v3 }
 0x4f1   :  { %v735_v53 = vpop.f32.mrf.mxu1 }
 0x4f2   :  { %v740_v60 = vadd.f32 %v739_v55, %v735_v53 }
 0x4f4   :  { %741 = vadd.xlane.f32.xlu0 %v740_v60 }
 0x50a   :  { %767 = vperm.xlu0 %1088, %v764_v46  }
 0x57d   :  { %v742_v63 = vpop.xlane.xlu0 %741 }
 0x57e   :  { %v743_v11 = vmul.f32 0.001953125, %v742_v63 }
 0x580   :  { %v744_v7 = vsub.f32 %v662_v1, %v743_v11  ;;  %v745_v15 = vsub.f32 %v664_v52, %v743_v11  ;;  %v746_v14 = vsub.f32 %v733_v3, %v743_v11  ;;  %v747_v16 = vsub.f32 %v735_v53, %v743_v11 }
 0x582   :  { %v748_v2 = vmul.f32 %v744_v7, %v744_v7  ;;  %v749_v18 = vmul.f32 %v745_v15, %v745_v15  ;;  %v750_v62 = vmul.f32 %v746_v14, %v746_v14  ;;  %v751_v24 = vmul.f32 %v747_v16, %v747_v16 }
 0x584   :  { %v752_v23 = vadd.f32 %v749_v18, %v748_v2 }
 0x585   :  { %v768_v37 = vpop.permute.xlu0 %767 }
 0x586   :  { %v753_v25 = vadd.f32 %v752_v23, %v750_v62 }
 0x588   :  { %v754_v26 = vadd.f32 %v753_v25, %v751_v24 }
 0x58a   :  { %755 = vadd.xlane.f32.xlu1 %v754_v26 }
 0x59b   :  { %777 = vperm.xlu1 %1089, %v774_v27  }
 0x613   :  { %v756_v17 = vpop.xlane.xlu1 %755 }
 0x614   :  { %v757_v61 = vmul.f32 0.001953125, %v756_v17 }
 0x616   :  { %v758_v30 = vadd.f32 1e-05, %v757_v61 }
 0x617   :  { %v778_v22 = vpop.permute.xlu1 %777 }
 0x618   :  { %1092 = vrsqrt.f32 %v758_v30 }
 0x625   :  { %v1093_v5 = vpop.eup %1092 }
 0x626   :  { %v760_v33 = vmul.f32 %v1093_v5, %v744_v7  ;;  %v761_v12 = vmul.f32 %v1093_v5, %v745_v15  ;;  %v762_v34 = vmul.f32 %v1093_v5, %v746_v14  ;;  %v763_v36 = vmul.f32 %v1093_v5, %v747_v16 }
 0x628   :  { %v770_v40 = vmul.f32 %v768_v37, %v760_v33  ;;  %v771_v44 = vmul.f32 %v768_v37, %v761_v12  ;;  %v772_v45 = vmul.f32 %v768_v37, %v762_v34  ;;  %v773_v43 = vmul.f32 %v768_v37, %v763_v36 }
 0x62a   :  { %v780_v49 = vadd.f32 %v778_v22, %v770_v40  ;;  %v781_v13 = vadd.f32 %v778_v22, %v771_v44  ;;  %v782_v56 = vadd.f32 %v778_v22, %v772_v45  ;;  %v783_v58 = vadd.f32 %v778_v22, %v773_v43 }
 0x62c   :  { %v1651_v9 = vmax.f32 %v780_v49, 0.0  ;;  %v1653_v59 = vmax.f32 %v781_v13, 0.0  ;;  %v1659_v48 = vmax.f32 %v782_v56, 0.0  ;;  %v1661_v35 = vmax.f32 %v783_v58, 0.0 }
 0x62e   :  { %806 = vrot.lane.b32.xlu1 %v1653_v59, %s1095_s19  ;;  %804 = vrot.lane.b32.xlu0 %v1651_v9, %s1095_s19 }
 0x632   :  { %810 = vrot.lane.b32.xlu1 %v1661_v35, %s1095_s19  ;;  %808 = vrot.lane.b32.xlu0 %v1659_v48, %s1095_s19 }
 0x636   :  { %790 = vrot.lane.b32.xlu1 %v1653_v59, %s1096_s24  ;;  %788 = vrot.lane.b32.xlu0 %v1651_v9, %s1096_s24 }
 0x63a   :  { %794 = vrot.lane.b32.xlu1 %v1661_v35, %s1096_s24  ;;  %792 = vrot.lane.b32.xlu0 %v1659_v48, %s1096_s24 }
 0x63e   :  { %886 = vrot.lane.b32.xlu1 %v1653_v59, %s1097_s0  ;;  %884 = vrot.lane.b32.xlu0 %v1651_v9, %s1097_s0 }
 0x642   :  { %890 = vrot.lane.b32.xlu1 %v1661_v35, %s1097_s0  ;;  %888 = vrot.lane.b32.xlu0 %v1659_v48, %s1097_s0 }
 0x646   :  { %838 = vrot.lane.b32.xlu1 %v1653_v59, %s1098_s25  ;;  %836 = vrot.lane.b32.xlu0 %v1651_v9, %s1098_s25 }
 0x64a   :  { %842 = vrot.lane.b32.xlu1 %v1661_v35, %s1098_s25  ;;  %840 = vrot.lane.b32.xlu0 %v1659_v48, %s1098_s25 }
 0x6a0   :  { %v807_v28 = vpop.permute.xlu1 %806  ;;  %v805_v54 = vpop.permute.xlu0 %804 }
 0x6a1   :  { %v814_v4 = vsel %vm160_vm2, %v805_v54, %v807_v28 }
 0x6a2   :  { %v1694_v47 = vmul.f32 %v814_v4, %v1248_v31 }
 0x6a4   :  { %v811_v29 = vpop.permute.xlu1 %810  ;;  %900 = vrot.lane.b32.xlu0 %v1694_v47, %s1097_s0  ;;  %v809_v39 = vpop.permute.xlu0 %808 }
 0x6a5   :  { %v812_v0 = vsel %vm160_vm2, %v809_v39, %v811_v29  ;;  %v813_v1 = vsel %vm160_vm2, %v807_v28, %v809_v39  ;;  %v815_v31 = vsel %vm160_vm2, %v811_v29, %v805_v54 }
 0x6a6   :  { %v1703_v52 = vmul.f32 %v813_v1, %v1229_v20  ;;  %v1706_v8 = vmul.f32 %v812_v0, %v1232_v21  ;;  %v1715_v53 = vmul.f32 %v815_v31, %v1271_v42 }
 0x6a8   :  { %v791_v3 = vpop.permute.xlu1 %790  ;;  %902 = vrot.lane.b32.xlu1 %v1703_v52, %s1097_s0  ;;  %904 = vrot.lane.b32.xlu0 %v1706_v8, %s1097_s0  ;;  %v789_v55 = vpop.permute.xlu0 %788 }
 0x6a9   :  { %v798_v20 = vsel %vm143_vm5, %v789_v55, %v791_v3 }
 0x6aa   :  { %v1724_v63 = vmul.f32 %v798_v20, %v1251_v32 }
 0x6ac   :  { %v795_v60 = vpop.permute.xlu1 %794  ;;  %906 = vrot.lane.b32.xlu1 %v1715_v53, %s1097_s0  ;;  %v793_v21 = vpop.permute.xlu0 %792 }
 0x6ad   :  { %v799_v46 = vsel %vm143_vm5, %v795_v60, %v789_v55  ;;  %v796_v42 = vsel %vm143_vm5, %v793_v21, %v795_v60  ;;  %v797_v7 = vsel %vm143_vm5, %v791_v3, %v793_v21 }
 0x6ae   :  { %v1727_v11 = vmul.f32 %v799_v46, %v1290_v50  ;;  %v1738_v15 = vmul.f32 %v797_v7, %v1268_v41  ;;  %v1741_v32 = vmul.f32 %v796_v42, %v1293_v51  ;;  %v917_v41 = vld [vmem:[%s1880_s10] sm:$0xff] }
 0x6b0   :  { %868 = vrot.lane.b32.xlu0 %v1727_v11, %s1097_s0  ;;  %870 = vrot.lane.b32.xlu1 %v1724_v63, %s1097_s0  ;;  %v885_v50 = vpop.permute.xlu0 %884  ;;  %v887_v51 = vpop.permute.xlu1 %886 }
 0x6b1   :  { %v894_v36 = vsel %vm226_vm11, %v885_v50, %v887_v51 }
 0x6b4   :  { %872 = vrot.lane.b32.xlu0 %v1738_v15, %s1097_s0  ;;  %874 = vrot.lane.b32.xlu1 %v1741_v32, %s1097_s0  ;;  %v889_v14 = vpop.permute.xlu0 %888  ;;  %v891_v16 = vpop.permute.xlu1 %890 }
 0x6b5   :  { %v893_v27 = vsel %vm226_vm11, %v887_v51, %v889_v14  ;;  %v895_v12 = vsel %vm226_vm11, %v891_v16, %v885_v50  ;;  %v892_v22 = vsel %vm226_vm11, %v889_v14, %v891_v16 }
 0x6b6   :  { %v897_v30 = vmul.f32 %v893_v27, %v1337_v10  ;;  %v899_v40 = vmul.f32 %v895_v12, %v1350_v19 }
 0x6b8   :  { %852 = vrot.lane.b32.xlu0 %v1694_v47, %s1098_s25  ;;  %854 = vrot.lane.b32.xlu1 %v1703_v52, %s1098_s25  ;;  %v1766_v2 = vpop.permute.xlu0 %836  ;;  %v1768_v18 = vpop.permute.xlu1 %838 }
 0x6b9   :  { %v846_v55 = vsel %vm177_vm13, %v1766_v2, %v1768_v18 }
 0x6bc   :  { %856 = vrot.lane.b32.xlu0 %v1706_v8, %s1098_s25  ;;  %858 = vrot.lane.b32.xlu1 %v1715_v53, %s1098_s25  ;;  %v1770_v62 = vpop.permute.xlu0 %840  ;;  %v1772_v23 = vpop.permute.xlu1 %842 }
 0x6bd   :  { %v847_v1 = vsel %vm177_vm13, %v1772_v23, %v1766_v2  ;;  %v844_v60 = vsel %vm177_vm13, %v1770_v62, %v1772_v23 }
 0x6c0   :  { %820 = vrot.lane.b32.xlu0 %v1727_v11, %s1098_s25  ;;  %822 = vrot.lane.b32.xlu1 %v1724_v63, %s1098_s25 }
 0x6c4   :  { %824 = vrot.lane.b32.xlu0 %v1738_v15, %s1098_s25  ;;  %826 = vrot.lane.b32.xlu1 %v1741_v32, %s1098_s25 }
 0x6c8   :  { %920 = vperm.xlu0 %1088, %v917_v41   ;;  %v916_v41 = vld [vmem:[%s1881_s9] sm:$0xff] }
 0x716   :  { %v901_v24 = vpop.permute.xlu0 %900 }
 0x71a   :  { %v903_v25 = vpop.permute.xlu1 %902  ;;  %v905_v26 = vpop.permute.xlu0 %904 }
 0x71b   :  { %v909_v17 = vsel %vm226_vm11, %v903_v25, %v905_v26  ;;  %v910_v5 = vsel %vm226_vm11, %v901_v24, %v903_v25 }
 0x71c   :  { %v913_v61 = vmul.f32 %v909_v17, %v1337_v10 }
 0x71e   :  { %v907_v33 = vpop.permute.xlu1 %906  ;;  %940 = vmatprep.subr.mxu0 %v913_v61 }
 0x71f   :  { %v911_v34 = vsel %vm226_vm11, %v907_v33, %v901_v24  ;;  %941 = vmatpush1.msra.mxu0 %v910_v5  ;;  %v908_v44 = vsel %vm226_vm11, %v905_v26, %v907_v33 }
 0x720   :  { %v915_v37 = vmul.f32 %v911_v34, %v1350_v19  ;;  %942 = vmatprep.subr.mxu0 %v897_v30 }
 0x721   :  { %943 = vmatpush1.msra.mxu0 %v894_v36 }
 0x722   :  { %v871_v45 = vpop.permute.xlu1 %870  ;;  %1011 = vmatprep.subr.mxu1 %v915_v37  ;;  %v869_v43 = vpop.permute.xlu0 %868 }
 0x723   :  { %1012 = vmatpush1.msra.mxu1 %v908_v44  ;;  %v878_v4 = vsel %vm226_vm11, %v869_v43, %v871_v45 }
 0x724   :  { %1013 = vmatprep.subr.mxu1 %v899_v40 }
 0x725   :  { %1014 = vmatpush1.msra.mxu1 %v892_v22 }
 0x726   :  { %v875_v49 = vpop.permute.xlu1 %874  ;;  %v873_v13 = vpop.permute.xlu0 %872 }
 0x727   :  { %v879_v56 = vsel %vm226_vm11, %v875_v49, %v869_v43  ;;  %v877_v58 = vsel %vm226_vm11, %v871_v45, %v873_v13  ;;  %v876_v29 = vsel %vm226_vm11, %v873_v13, %v875_v49 }
 0x728   :  { %v883_v28 = vmul.f32 %v879_v56, %v1350_v19  ;;  %v881_v54 = vmul.f32 %v877_v58, %v1337_v10 }
 0x72a   :  { %v855_v39 = vpop.permute.xlu1 %854  ;;  %944 = vmatprep.subr.mxu0 %v881_v54  ;;  %1015 = vmatprep.subr.mxu1 %v883_v28  ;;  %v853_v0 = vpop.permute.xlu0 %852 }
 0x72b   :  { %945 = vmatpush1.msra.mxu0 %v878_v4  ;;  %1016 = vmatpush1.msra.mxu1 %v876_v29 }
 0x72c   :  { %946 = vmatprep.subr.mxu0 %v1703_v52  ;;  %1017 = vmatprep.subr.mxu1 %v1715_v53  ;;  %v848_v53 = vmul.f32 %v847_v1, %v1385_v38 }
 0x72d   :  { %947 = vmatpush1.msra.mxu0 %v1694_v47  ;;  %1018 = vmatpush1.msra.mxu1 %v1706_v8 }
 0x72e   :  { %v859_v10 = vpop.permute.xlu1 %858  ;;  %948 = vmatprep.subr.mxu0 %v1653_v59  ;;  %1019 = vmatprep.subr.mxu1 %v1661_v35  ;;  %v857_v19 = vpop.permute.xlu0 %856  ;;  %v845_v59 = vsel %vm177_vm13, %v1768_v18, %v1770_v62 }
 0x72f   :  { %v863_v52 = vsel %vm177_vm13, %v859_v10, %v853_v0  ;;  %v861_v31 = vsel %vm177_vm13, %v855_v39, %v857_v19  ;;  %949 = vmatpush1.msra.mxu0 %v1651_v9  ;;  %1020 = vmatpush1.msra.mxu1 %v1659_v48  ;;  %v862_v9 = vsel %vm177_vm13, %v853_v0, %v855_v39 }
 0x730   :  { %v864_v35 = vmul.f32 %v863_v52, %v1385_v38  ;;  %v866_v47 = vmul.f32 %v861_v31, %v1413_v57  ;;  %950 = vmatprep.subr.mxu0 %v1724_v63  ;;  %1021 = vmatprep.subr.mxu1 %v1741_v32  ;;  %v860_v48 = vsel %vm177_vm13, %v857_v19, %v859_v10 }
 0x731   :  { %951 = vmatpush1.msra.mxu0 %v1727_v11  ;;  %1022 = vmatpush1.msra.mxu1 %v1738_v15  ;;  %v850_v20 = vmul.f32 %v845_v59, %v1413_v57 }
 0x732   :  { %v823_v8 = vpop.permute.xlu1 %822  ;;  %952 = vmatprep.subr.mxu0 %v862_v9  ;;  %1023 = vmatprep.subr.mxu1 %v860_v48  ;;  %v821_v3 = vpop.permute.xlu0 %820 }
 0x733   :  { %953 = vmatpush1.msra.mxu0 %v864_v35  ;;  %1024 = vmatpush1.msra.mxu1 %v866_v47  ;;  %v830_v21 = vsel %vm177_vm13, %v821_v3, %v823_v8 }
 0x734   :  { %954 = vmatprep.subr.mxu0 %v846_v55  ;;  %1025 = vmatprep.subr.mxu1 %v844_v60 }
 0x735   :  { %955 = vmatpush1.msra.mxu0 %v848_v53  ;;  %1026 = vmatpush1.msra.mxu1 %v850_v20 }
 0x736   :  { %v827_v46 = vpop.permute.xlu1 %826  ;;  %956 = vmatprep.subr.mxu0 %v830_v21  ;;  %v825_v63 = vpop.permute.xlu0 %824 }
 0x737   :  { %v831_v11 = vsel %vm177_vm13, %v827_v46, %v821_v3  ;;  %v829_v42 = vsel %vm177_vm13, %v823_v8, %v825_v63  ;;  %v828_v7 = vsel %vm177_vm13, %v825_v63, %v827_v46 }
 0x738   :  { %v832_v15 = vmul.f32 %v831_v11, %v1385_v38  ;;  %v834_v32 = vmul.f32 %v829_v42, %v1413_v57  ;;  %1027 = vmatprep.subr.mxu1 %v828_v7 }
 0x73a   :  { %957 = vmatpush1.msra.mxu0 %v832_v15  ;;  %1028 = vmatpush1.msra.mxu1 %v834_v32 }
 0x73b   :  { %1080 = vmatmul.mubr.msk.f32.vlgmr.msra.gmra.mxu0 %vm268_vm0, %v916_v41  ;;  %1081 = vmatmul.mubr.msk.f32.vlgmr.msra.gmra.mxu1 %vm268_vm0, %v916_v41 }
 0x743   :  { %v921_v50 = vpop.permute.xlu0 %920 }
 0x7fb   :  { %v992_v51 = vpop.f32.mrf.mxu0  ;;  %v1063_v14 = vpop.f32.mrf.mxu1 }
 0x7fc   :  { %v993_v6 = vadd.f32 %v992_v51, %v921_v50  ;;  %v1064_v16 = vadd.f32 %v1063_v14, %v921_v50 }
 0x7fd   :  { %v994_v2 = vpop.f32.mrf.mxu0  ;;  %v1065_v38 = vpop.f32.mrf.mxu1 }
 0x7fe   :  { %1068 = vst [vmem:[%s1882_s11] sm:$0xff] %v993_v6  ;;  %1070 = vst [vmem:[%s1882_s11 + $0x10] sm:$0xff] %v1064_v16  ;;  %v995_v57 = vadd.f32 %v994_v2, %v921_v50  ;;  %v1066_v18 = vadd.f32 %v1065_v38, %v921_v50 }
 0x800   :  { %1069 = vst [vmem:[%s1882_s11 + $0x8] sm:$0xff] %v995_v57  ;;  %1071 = vst [vmem:[%s1882_s11 + $0x18] sm:$0xff] %v1066_v18 }

</bundles_post_ra>
